<compile_context>
chip_gen: v5e
topology: v5e:2x2
jax: 0.10.0
libtpu: 0.0.40
codegen_flags: <defaults>
</compile_context>

<pallas_src>
import jax
import jax.numpy as jnp
import numpy as np
from jax.experimental import pallas as pl
from jax.experimental.pallas import tpu as pltpu


# ----------------------------- config helper (mirrors the PyTorch C2D) -----
class C2D:
    def __init__(self, output_channel, input_channel=None, activation="relu",
                 kernel_size=3, stride=1, padding=None):
        self.input_channel = input_channel
        self.output_channel = output_channel
        self.activation = activation
        self.kernel_size = kernel_size
        self.stride = stride
        self.padding = padding


# ----------------------------- small host-side helpers ----------------------
def _grid_steps(n_batch):
    """2 'parallel' steps only on chips with 2 TensorCores per Pallas program
    (v4/v5p megacore, v7x); a single step on single-TC v5e/v6e."""
    try:
        kind = jax.devices()[0].device_kind.lower()
    except Exception:
        kind = ""
    two_tc = any(tag in kind for tag in ("v4", "v5p", "v7"))
    if two_tc and n_batch >= 2 and n_batch % 2 == 0:
        return 2
    return 1


def _fold_rows(h, w, max_c, cout_last, nb):
    """Row-fold factor R for pure-1x1 blocks: view (H, W*C) as (H/R, R*W*C) so the
    matmul / stores are lane-dense (prefer multiples of 128 lanes), while keeping
    K bounded and >= 8 matmul rows."""
    best, best_key = 1, ((w * cout_last) % 128 == 0, 1)
    for r in range(1, h + 1):
        if h % r:
            continue
        if r * w * max_c > 512 or nb * (h // r) < 8:
            continue
        key = ((r * w * cout_last) % 128 == 0, r)
        if key > best_key:
            best, best_key = r, key
    return best


# ----------------------------- fused per-block Pallas kernel ----------------
def _make_block_kernel(metas, n_layers, nb):
    """Fused conv(+bias)(+ReLU) chain for one adaptation block.

    metas[l] = (kh, ph, hin, hout, k_in, n_out, relu)
    Ref order: x, (w0, b0, w1, b1, ...), o, pad_scratch
      x        : (nb, H0, W0*C0)                lane-dense input slab
      w_l      : (kh, W_in*Cin, Wout*Cout)      banded per-tap-row weights
      b_l      : (1, Wout*Cout)                 bias tiled over output columns
      o        : (nb, Hout, Wout*Cout)
      pad      : (nb*max_stride, max_k) VMEM    vertically padded, batch-stacked
    """
    def kernel(*refs):
        x_ref = refs[0]
        w_refs = [refs[1 + 2 * l] for l in range(n_layers)]
        b_refs = [refs[2 + 2 * l] for l in range(n_layers)]
        o_ref = refs[1 + 2 * n_layers]
        pad_ref = refs[2 + 2 * n_layers]

        # per-batch 2-D activations, kept entirely in VMEM/vregs
        acts = [x_ref[b].astype(jnp.float32) for b in range(nb)]   # (H, W*Cin)

        for l, (kh, ph, hin, hout, k_in, n_out, relu) in enumerate(metas):
            stride = hin + 2 * ph

            if kh == 1 and ph == 0 and nb == 1:
                # single image, 1x1 conv: block-diagonal matmul, no scratch needed
                y = jnp.dot(acts[0], w_refs[l][0],
                            preferred_element_type=jnp.float32)
            else:
                # Stack the batch (with vertical halo rows) along the scratch rows;
                # zero ONLY the halo rows (horizontal padding lives in the weights).
                for b in range(nb):
                    base = b * stride
                    if ph > 0:
                        zrow = jnp.zeros((ph, k_in), jnp.float32)
                        pad_ref[base:base + ph, :k_in] = zrow
                        pad_ref[base + ph + hin:base + stride, :k_in] = zrow
                    pad_ref[base + ph:base + ph + hin, :k_in] = acts[b]

                m_rows = nb * stride - (kh - 1)
                y = None
                for i in range(kh):                      # kh contiguous-slab matmuls
                    t = jnp.dot(pad_ref[i:i + m_rows, :k_in], w_refs[l][i],
                                preferred_element_type=jnp.float32)
                    y = t if y is None else y + t

            y = y + b_refs[l][...]
            if relu:
                y = jnp.maximum(y, 0.0)

            if kh == 1 and ph == 0 and nb == 1:
                acts = [y]
            else:
                # valid rows per batch; the kh-1 rows between images are junk
                acts = [y[b * stride:b * stride + hout, :] for b in range(nb)]

        for b in range(nb):
            o_ref[b] = acts[b].astype(o_ref.dtype)

    return kernel


def block_forward_pallas(x_nchw, block_params):
    """Run one adaptation block (a fused chain of convs) with a single pallas_call.

    block_params: list of (w_oihw, bias, relu, stride, padding).
    """
    N, C0, H0, W0 = x_nchw.shape
    G = _grid_steps(N)
    NB = N // G

    # Row folding for pure-1x1 chains -> 128-lane dense matmuls and stores.
    all_1x1 = all(w.shape[2] == 1 and w.shape[3] == 1 and s == 1
                  and (p is None or int(p) == 0)
                  for (w, _b, _r, s, p) in block_params)
    if all_1x1:
        max_c = max([C0] + [w.shape[0] for (w, *_rest) in block_params])
        cout_last = block_params[-1][0].shape[0]
        R = _fold_rows(H0, W0, max_c, cout_last, NB)
    else:
        R = 1
    Hf, Wf = H0 // R, W0 * R

    metas = []
    flat_params = []
    h, w_sp, c = Hf, Wf, C0
    max_stride, max_k = 8, 128
    for (w_oihw, bias, relu, stride, padding) in block_params:
        cout, cin, kh, kw = w_oihw.shape
        assert cin == c, "channel chaining mismatch"
        assert stride == 1  # TODO(synk): stride != 1 not implemented in the Pallas path
        ph = kh // 2 if padding is None else int(padding)
        pw = kw // 2 if padding is None else int(padding)
        hout = h + 2 * ph - kh + 1
        wout = w_sp + 2 * pw - kw + 1
        k_in = w_sp * cin
        n_out = wout * cout
        metas.append((kh, ph, h, hout, k_in, n_out, bool(relu)))
        max_stride = max(max_stride, h + 2 * ph)
        max_k = max(max_k, k_in)

        # Banded weight: horizontal taps + horizontal zero-padding folded in.
        #   wb[i, ic*cin + ci, x*cout + co] = w[co, ci, i, x+... ]  (tap row i)
        w_np = np.asarray(w_oihw, dtype=np.float32)
        wb = np.zeros((kh, k_in, n_out), np.float32)
        for i in range(kh):
            for x in range(wout):
                for j in range(kw):
                    ic = x + j - pw
                    if 0 <= ic < w_sp:
                        wb[i, ic * cin:(ic + 1) * cin,
                           x * cout:(x + 1) * cout] = w_np[:, :, i, j].T
        b_row = np.tile(np.asarray(bias, dtype=np.float32), wout).reshape(1, n_out)
        flat_params.append(jnp.asarray(wb))
        flat_params.append(jnp.asarray(b_row))
        h, w_sp, c = hout, wout, cout

    n_layers = len(block_params)
    kernel = _make_block_kernel(tuple(metas), n_layers, NB)

    # NCHW -> NHWC once per block, flattened lane-dense to (N, H, W*C) (free reshape).
    x_flat = jnp.transpose(x_nchw, (0, 2, 3, 1)).reshape(N, Hf, Wf * C0)

    in_specs = [pl.BlockSpec((NB, Hf, Wf * C0), lambda n: (n, 0, 0))]
    for arr in flat_params:
        if arr.ndim == 3:
            in_specs.append(pl.BlockSpec(arr.shape, lambda n: (0, 0, 0)))
        else:
            in_specs.append(pl.BlockSpec(arr.shape, lambda n: (0, 0)))
    out_spec = pl.BlockSpec((NB, h, w_sp * c), lambda n: (n, 0, 0))

    out_flat = pl.pallas_call(
        kernel,
        out_shape=jax.ShapeDtypeStruct((N, h, w_sp * c), x_nchw.dtype),
        grid_spec=pltpu.PrefetchScalarGridSpec(
            num_scalar_prefetch=0,
            grid=(G,),                      # 1 step on v5e/v6e, 2 parallel on 2-TC chips
            in_specs=in_specs,
            out_specs=out_spec,
            scratch_shapes=[pltpu.VMEM((NB * max_stride, max_k), jnp.float32)],
        ),
        compiler_params=pltpu.CompilerParams(dimension_semantics=("parallel",)),
    )(x_flat, *flat_params)

    # Undo row folding + back to NCHW (contiguous reshapes, free in the wrapper).
    H_out, W_out = h * R, w_sp // R
    out_nhwc = out_flat.reshape(N, H_out, W_out, c)
    return jnp.transpose(out_nhwc, (0, 3, 1, 2))


# ----------------------------- adaptation_layers in JAX --------------------
def build_adaptation_params(layers_config, key):
    """Deterministic init (kaiming-normal fan_out conv weights, zero bias),
    matching the shapes CNN_constructer would create."""
    all_params = []
    for block_cfg in layers_config:
        convs = [cfg for cfg in block_cfg if isinstance(cfg, C2D)]
        for i in range(1, len(convs)):
            if convs[i].input_channel is None:
                convs[i].input_channel = convs[i - 1].output_channel
        block_params = []
        for cfg in convs:
            key, sub = jax.random.split(key)
            fan_out = cfg.kernel_size * cfg.kernel_size * cfg.output_channel
            std = (2.0 / fan_out) ** 0.5
            w = std * jax.random.normal(
                sub, (cfg.output_channel, cfg.input_channel,
                      cfg.kernel_size, cfg.kernel_size), jnp.float32)
            bias = jnp.zeros((cfg.output_channel,), jnp.float32)
            block_params.append((w, bias, cfg.activation == "relu",
                                 cfg.stride, cfg.padding))
        all_params.append(block_params)
    return all_params


def adaptation_layers_forward(inputs, all_params, detach=False):
    # detach is a no-op in a pure forward pass (stop_gradient keeps semantics).
    out = []
    for x, block_params in zip(inputs, all_params):
        if detach:
            x = jax.lax.stop_gradient(x)
        out.append(block_forward_pallas(x, block_params))
    return out


# ----------------------------- pure-JAX reference for validation -----------
def _conv_ref(x, w, b, relu, stride, padding):
    kh, kw = w.shape[2], w.shape[3]
    ph = kh // 2 if padding is None else int(padding)
    pw = kw // 2 if padding is None else int(padding)
    y = jax.lax.conv_general_dilated(
        x, w, window_strides=(stride, stride),
        padding=[(ph, ph), (pw, pw)],
        dimension_numbers=("NCHW", "OIHW", "NCHW"))
    y = y + b[None, :, None, None]
    return jnp.maximum(y, 0.0) if relu else y


def adaptation_layers_ref(inputs, all_params):
    out = []
    for x, block_params in zip(inputs, all_params):
        for (w, b, relu, stride, padding) in block_params:
            x = _conv_ref(x, w, b, relu, stride, padding)
        out.append(x)
    return out


# ----------------------------- main -----------------------------------------
if __name__ == "__main__":
    key = jax.random.PRNGKey(0)

    # Two adaptation blocks (typical feature-alignment usage):
    #   block 0: 3x3 conv(4->8)+ReLU, 3x3 conv(8->8)+ReLU  on (2, 4, 16, 16)
    #   block 1: 1x1 conv(6->8)+ReLU                        on (2, 6,  8,  8)
    layers_config = [
        [C2D(8, input_channel=4, kernel_size=3), C2D(8, kernel_size=3)],
        [C2D(8, input_channel=6, kernel_size=1)],
    ]

    key, k_p, k_x0, k_x1 = jax.random.split(key, 4)
    params = build_adaptation_params(layers_config, k_p)

    inputs = [
        jax.random.normal(k_x0, (2, 4, 16, 16), jnp.float32),
        jax.random.normal(k_x1, (2, 6, 8, 8), jnp.float32),
    ]

    outs = adaptation_layers_forward(inputs, params)
    outs = [jax.block_until_ready(o) for o in outs]

    refs = adaptation_layers_ref(inputs, params)
    for o, r in zip(outs, refs):
        assert o.shape == r.shape and o.dtype == r.dtype
        np.testing.assert_allclose(np.asarray(o), np.asarray(r),
                                   rtol=1e-4, atol=1e-4)

    print("KERNEL_OK")
</pallas_src>

<mosaic_0001>
module attributes {stable_mosaic.version = 11 : i64} {
  func.func @kernel(%arg0: i32, %arg1: memref<2x16x64xf32, #tpu.memory_space<vmem>>, %arg2: memref<3x64x128xf32, #tpu.memory_space<vmem>>, %arg3: memref<1x128xf32, #tpu.memory_space<vmem>>, %arg4: memref<3x128x128xf32, #tpu.memory_space<vmem>>, %arg5: memref<1x128xf32, #tpu.memory_space<vmem>>, %arg6: memref<2x16x128xf32, #tpu.memory_space<vmem>>, %arg7: memref<36x128xf32, #tpu.memory_space<vmem>>) attributes {dimension_semantics = [#tpu.dimension_semantics<parallel>], iteration_bounds = array<i64: 1>, scalar_prefetch = 0 : i64, scratch_operands = 1 : i64, tpu.core_type = #tpu.core_type<tc>, window_params = [{transform_indices = @transform_0, window_bounds = array<i64: 2, 16, 64>}, {pipeline_mode = #tpu.pipeline_mode<synchronous>, transform_indices = @transform_1, window_bounds = array<i64: 3, 64, 128>}, {pipeline_mode = #tpu.pipeline_mode<synchronous>, transform_indices = @transform_2, window_bounds = array<i64: 1, 128>}, {pipeline_mode = #tpu.pipeline_mode<synchronous>, transform_indices = @transform_3, window_bounds = array<i64: 3, 128, 128>}, {pipeline_mode = #tpu.pipeline_mode<synchronous>, transform_indices = @transform_4, window_bounds = array<i64: 1, 128>}, {transform_indices = @transform_5, window_bounds = array<i64: 2, 16, 128>}]} {
    %c0 = arith.constant 0 : index
    %c0_0 = arith.constant 0 : index
    %c0_1 = arith.constant 0 : index
    %0 = vector.load %arg1[%c0, %c0_0, %c0_1] : memref<2x16x64xf32, #tpu.memory_space<vmem>>, vector<1x16x64xf32>
    %1 = vector.shape_cast %0 : vector<1x16x64xf32> to vector<16x64xf32>
    %c1 = arith.constant 1 : index
    %c0_2 = arith.constant 0 : index
    %c0_3 = arith.constant 0 : index
    %2 = vector.load %arg1[%c1, %c0_2, %c0_3] : memref<2x16x64xf32, #tpu.memory_space<vmem>>, vector<1x16x64xf32>
    %3 = vector.shape_cast %2 : vector<1x16x64xf32> to vector<16x64xf32>
    %cst = arith.constant 0.000000e+00 : f32
    %4 = vector.broadcast %cst : f32 to vector<1x64xf32>
    %c0_4 = arith.constant 0 : index
    %c0_5 = arith.constant 0 : index
    %5 = vector.load %arg7[%c0_4, %c0_5] : memref<36x128xf32, #tpu.memory_space<vmem>>, vector<1x64xf32>
    tpu.vector_store %arg7[%c0_4, %c0_5], %4 {strides = array<i32>} : memref<36x128xf32, #tpu.memory_space<vmem>>, vector<1x64xf32>,
    %c17 = arith.constant 17 : index
    %c0_6 = arith.constant 0 : index
    %6 = vector.load %arg7[%c17, %c0_6] : memref<36x128xf32, #tpu.memory_space<vmem>>, vector<1x64xf32>
    tpu.vector_store %arg7[%c17, %c0_6], %4 {strides = array<i32>} : memref<36x128xf32, #tpu.memory_space<vmem>>, vector<1x64xf32>,
    %c1_7 = arith.constant 1 : index
    %c0_8 = arith.constant 0 : index
    %7 = vector.load %arg7[%c1_7, %c0_8] : memref<36x128xf32, #tpu.memory_space<vmem>>, vector<16x64xf32>
    tpu.vector_store %arg7[%c1_7, %c0_8], %1 {strides = array<i32>} : memref<36x128xf32, #tpu.memory_space<vmem>>, vector<16x64xf32>,
    %cst_9 = arith.constant 0.000000e+00 : f32
    %8 = vector.broadcast %cst_9 : f32 to vector<1x64xf32>
    %c18 = arith.constant 18 : index
    %c0_10 = arith.constant 0 : index
    %9 = vector.load %arg7[%c18, %c0_10] : memref<36x128xf32, #tpu.memory_space<vmem>>, vector<1x64xf32>
    tpu.vector_store %arg7[%c18, %c0_10], %8 {strides = array<i32>} : memref<36x128xf32, #tpu.memory_space<vmem>>, vector<1x64xf32>,
    %c35 = arith.constant 35 : index
    %c0_11 = arith.constant 0 : index
    %10 = vector.load %arg7[%c35, %c0_11] : memref<36x128xf32, #tpu.memory_space<vmem>>, vector<1x64xf32>
    tpu.vector_store %arg7[%c35, %c0_11], %8 {strides = array<i32>} : memref<36x128xf32, #tpu.memory_space<vmem>>, vector<1x64xf32>,
    %c19 = arith.constant 19 : index
    %c0_12 = arith.constant 0 : index
    %11 = vector.load %arg7[%c19, %c0_12] : memref<36x128xf32, #tpu.memory_space<vmem>>, vector<16x64xf32>
    tpu.vector_store %arg7[%c19, %c0_12], %3 {strides = array<i32>} : memref<36x128xf32, #tpu.memory_space<vmem>>, vector<16x64xf32>,
    %c0_13 = arith.constant 0 : index
    %c0_14 = arith.constant 0 : index
    %12 = vector.load %arg7[%c0_13, %c0_14] : memref<36x128xf32, #tpu.memory_space<vmem>>, vector<34x64xf32>
    %c0_15 = arith.constant 0 : index
    %c0_16 = arith.constant 0 : index
    %c0_17 = arith.constant 0 : index
    %13 = vector.load %arg2[%c0_15, %c0_16, %c0_17] : memref<3x64x128xf32, #tpu.memory_space<vmem>>, vector<1x64x128xf32>
    %14 = vector.shape_cast %13 : vector<1x64x128xf32> to vector<64x128xf32>
    %cst_18 = arith.constant dense<0.000000e+00> : vector<34x128xf32>
    %15 = tpu.matmul %12, %14, %cst_18 {dimension_numbers = #tpu.dot_dimension_numbers<[1], [0], [0], [1], [0, 0, 1, 1], [], []>} : vector<34x64xf32>, vector<64x128xf32>, vector<34x128xf32> -> vector<34x128xf32>
    %c1_19 = arith.constant 1 : index
    %c0_20 = arith.constant 0 : index
    %16 = vector.load %arg7[%c1_19, %c0_20] : memref<36x128xf32, #tpu.memory_space<vmem>>, vector<34x64xf32>
    %c1_21 = arith.constant 1 : index
    %c0_22 = arith.constant 0 : index
    %c0_23 = arith.constant 0 : index
    %17 = vector.load %arg2[%c1_21, %c0_22, %c0_23] : memref<3x64x128xf32, #tpu.memory_space<vmem>>, vector<1x64x128xf32>
    %18 = vector.shape_cast %17 : vector<1x64x128xf32> to vector<64x128xf32>
    %cst_24 = arith.constant dense<0.000000e+00> : vector<34x128xf32>
    %19 = tpu.matmul %16, %18, %cst_24 {dimension_numbers = #tpu.dot_dimension_numbers<[1], [0], [0], [1], [0, 0, 1, 1], [], []>} : vector<34x64xf32>, vector<64x128xf32>, vector<34x128xf32> -> vector<34x128xf32>
    %20 = arith.addf %15, %19 : vector<34x128xf32>
    %c2 = arith.constant 2 : index
    %c0_25 = arith.constant 0 : index
    %21 = vector.load %arg7[%c2, %c0_25] : memref<36x128xf32, #tpu.memory_space<vmem>>, vector<34x64xf32>
    %c2_26 = arith.constant 2 : index
    %c0_27 = arith.constant 0 : index
    %c0_28 = arith.constant 0 : index
    %22 = vector.load %arg2[%c2_26, %c0_27, %c0_28] : memref<3x64x128xf32, #tpu.memory_space<vmem>>, vector<1x64x128xf32>
    %23 = vector.shape_cast %22 : vector<1x64x128xf32> to vector<64x128xf32>
    %cst_29 = arith.constant dense<0.000000e+00> : vector<34x128xf32>
    %24 = tpu.matmul %21, %23, %cst_29 {dimension_numbers = #tpu.dot_dimension_numbers<[1], [0], [0], [1], [0, 0, 1, 1], [], []>} : vector<34x64xf32>, vector<64x128xf32>, vector<34x128xf32> -> vector<34x128xf32>
    %25 = arith.addf %20, %24 : vector<34x128xf32>
    %c0_30 = arith.constant 0 : index
    %c0_31 = arith.constant 0 : index
    %26 = vector.load %arg3[%c0_30, %c0_31] : memref<1x128xf32, #tpu.memory_space<vmem>>, vector<1x128xf32>
    %27 = vector.broadcast %26 : vector<1x128xf32> to vector<34x128xf32>
    %28 = arith.addf %25, %27 : vector<34x128xf32>
    %cst_32 = arith.constant 0.000000e+00 : f32
    %29 = vector.broadcast %cst_32 : f32 to vector<34x128xf32>
    %30 = arith.maximumf %28, %29 : vector<34x128xf32>
    %31 = vector.extract_strided_slice %30 {offsets = [0, 0], sizes = [16, 128], strides = [1, 1]} : vector<34x128xf32> to vector<16x128xf32>
    %32 = vector.extract_strided_slice %30 {offsets = [18, 0], sizes = [16, 128], strides = [1, 1]} : vector<34x128xf32> to vector<16x128xf32>
    %cst_33 = arith.constant 0.000000e+00 : f32
    %33 = vector.broadcast %cst_33 : f32 to vector<1x128xf32>
    %c0_34 = arith.constant 0 : index
    %c0_35 = arith.constant 0 : index
    %34 = vector.load %arg7[%c0_34, %c0_35] : memref<36x128xf32, #tpu.memory_space<vmem>>, vector<1x128xf32>
    tpu.vector_store %arg7[%c0_34, %c0_35], %33 {strides = array<i32>} : memref<36x128xf32, #tpu.memory_space<vmem>>, vector<1x128xf32>,
    %c17_36 = arith.constant 17 : index
    %c0_37 = arith.constant 0 : index
    %35 = vector.load %arg7[%c17_36, %c0_37] : memref<36x128xf32, #tpu.memory_space<vmem>>, vector<1x128xf32>
    tpu.vector_store %arg7[%c17_36, %c0_37], %33 {strides = array<i32>} : memref<36x128xf32, #tpu.memory_space<vmem>>, vector<1x128xf32>,
    %c1_38 = arith.constant 1 : index
    %c0_39 = arith.constant 0 : index
    %36 = vector.load %arg7[%c1_38, %c0_39] : memref<36x128xf32, #tpu.memory_space<vmem>>, vector<16x128xf32>
    tpu.vector_store %arg7[%c1_38, %c0_39], %31 {strides = array<i32>} : memref<36x128xf32, #tpu.memory_space<vmem>>, vector<16x128xf32>,
    %cst_40 = arith.constant 0.000000e+00 : f32
    %37 = vector.broadcast %cst_40 : f32 to vector<1x128xf32>
    %c18_41 = arith.constant 18 : index
    %c0_42 = arith.constant 0 : index
    %38 = vector.load %arg7[%c18_41, %c0_42] : memref<36x128xf32, #tpu.memory_space<vmem>>, vector<1x128xf32>
    tpu.vector_store %arg7[%c18_41, %c0_42], %37 {strides = array<i32>} : memref<36x128xf32, #tpu.memory_space<vmem>>, vector<1x128xf32>,
    %c35_43 = arith.constant 35 : index
    %c0_44 = arith.constant 0 : index
    %39 = vector.load %arg7[%c35_43, %c0_44] : memref<36x128xf32, #tpu.memory_space<vmem>>, vector<1x128xf32>
    tpu.vector_store %arg7[%c35_43, %c0_44], %37 {strides = array<i32>} : memref<36x128xf32, #tpu.memory_space<vmem>>, vector<1x128xf32>,
    %c19_45 = arith.constant 19 : index
    %c0_46 = arith.constant 0 : index
    %40 = vector.load %arg7[%c19_45, %c0_46] : memref<36x128xf32, #tpu.memory_space<vmem>>, vector<16x128xf32>
    tpu.vector_store %arg7[%c19_45, %c0_46], %32 {strides = array<i32>} : memref<36x128xf32, #tpu.memory_space<vmem>>, vector<16x128xf32>,
    %c0_47 = arith.constant 0 : index
    %c0_48 = arith.constant 0 : index
    %41 = vector.load %arg7[%c0_47, %c0_48] : memref<36x128xf32, #tpu.memory_space<vmem>>, vector<34x128xf32>
    %c0_49 = arith.constant 0 : index
    %c0_50 = arith.constant 0 : index
    %c0_51 = arith.constant 0 : index
    %42 = vector.load %arg4[%c0_49, %c0_50, %c0_51] : memref<3x128x128xf32, #tpu.memory_space<vmem>>, vector<1x128x128xf32>
    %43 = vector.shape_cast %42 : vector<1x128x128xf32> to vector<128x128xf32>
    %cst_52 = arith.constant dense<0.000000e+00> : vector<34x128xf32>
    %44 = tpu.matmul %41, %43, %cst_52 {dimension_numbers = #tpu.dot_dimension_numbers<[1], [0], [0], [1], [0, 0, 1, 1], [], []>} : vector<34x128xf32>, vector<128x128xf32>, vector<34x128xf32> -> vector<34x128xf32>
    %c1_53 = arith.constant 1 : index
    %c0_54 = arith.constant 0 : index
    %45 = vector.load %arg7[%c1_53, %c0_54] : memref<36x128xf32, #tpu.memory_space<vmem>>, vector<34x128xf32>
    %c1_55 = arith.constant 1 : index
    %c0_56 = arith.constant 0 : index
    %c0_57 = arith.constant 0 : index
    %46 = vector.load %arg4[%c1_55, %c0_56, %c0_57] : memref<3x128x128xf32, #tpu.memory_space<vmem>>, vector<1x128x128xf32>
    %47 = vector.shape_cast %46 : vector<1x128x128xf32> to vector<128x128xf32>
    %cst_58 = arith.constant dense<0.000000e+00> : vector<34x128xf32>
    %48 = tpu.matmul %45, %47, %cst_58 {dimension_numbers = #tpu.dot_dimension_numbers<[1], [0], [0], [1], [0, 0, 1, 1], [], []>} : vector<34x128xf32>, vector<128x128xf32>, vector<34x128xf32> -> vector<34x128xf32>
    %49 = arith.addf %44, %48 : vector<34x128xf32>
    %c2_59 = arith.constant 2 : index
    %c0_60 = arith.constant 0 : index
    %50 = vector.load %arg7[%c2_59, %c0_60] : memref<36x128xf32, #tpu.memory_space<vmem>>, vector<34x128xf32>
    %c2_61 = arith.constant 2 : index
    %c0_62 = arith.constant 0 : index
    %c0_63 = arith.constant 0 : index
    %51 = vector.load %arg4[%c2_61, %c0_62, %c0_63] : memref<3x128x128xf32, #tpu.memory_space<vmem>>, vector<1x128x128xf32>
    %52 = vector.shape_cast %51 : vector<1x128x128xf32> to vector<128x128xf32>
    %cst_64 = arith.constant dense<0.000000e+00> : vector<34x128xf32>
    %53 = tpu.matmul %50, %52, %cst_64 {dimension_numbers = #tpu.dot_dimension_numbers<[1], [0], [0], [1], [0, 0, 1, 1], [], []>} : vector<34x128xf32>, vector<128x128xf32>, vector<34x128xf32> -> vector<34x128xf32>
    %54 = arith.addf %49, %53 : vector<34x128xf32>
    %c0_65 = arith.constant 0 : index
    %c0_66 = arith.constant 0 : index
    %55 = vector.load %arg5[%c0_65, %c0_66] : memref<1x128xf32, #tpu.memory_space<vmem>>, vector<1x128xf32>
    %56 = vector.broadcast %55 : vector<1x128xf32> to vector<34x128xf32>
    %57 = arith.addf %54, %56 : vector<34x128xf32>
    %cst_67 = arith.constant 0.000000e+00 : f32
    %58 = vector.broadcast %cst_67 : f32 to vector<34x128xf32>
    %59 = arith.maximumf %57, %58 : vector<34x128xf32>
    %60 = vector.extract_strided_slice %59 {offsets = [0, 0], sizes = [16, 128], strides = [1, 1]} : vector<34x128xf32> to vector<16x128xf32>
    %61 = vector.extract_strided_slice %59 {offsets = [18, 0], sizes = [16, 128], strides = [1, 1]} : vector<34x128xf32> to vector<16x128xf32>
    %c0_68 = arith.constant 0 : index
    %c0_69 = arith.constant 0 : index
    %c0_70 = arith.constant 0 : index
    %62 = vector.load %arg6[%c0_68, %c0_69, %c0_70] : memref<2x16x128xf32, #tpu.memory_space<vmem>>, vector<1x16x128xf32>
    %63 = vector.shape_cast %62 : vector<1x16x128xf32> to vector<16x128xf32>
    %64 = vector.shape_cast %60 : vector<16x128xf32> to vector<1x16x128xf32>
    tpu.vector_store %arg6[%c0_68, %c0_69, %c0_70], %64 {strides = array<i32>} : memref<2x16x128xf32, #tpu.memory_space<vmem>>, vector<1x16x128xf32>,
    %c1_71 = arith.constant 1 : index
    %c0_72 = arith.constant 0 : index
    %c0_73 = arith.constant 0 : index
    %65 = vector.load %arg6[%c1_71, %c0_72, %c0_73] : memref<2x16x128xf32, #tpu.memory_space<vmem>>, vector<1x16x128xf32>
    %66 = vector.shape_cast %65 : vector<1x16x128xf32> to vector<16x128xf32>
    %67 = vector.shape_cast %61 : vector<16x128xf32> to vector<1x16x128xf32>
    tpu.vector_store %arg6[%c1_71, %c0_72, %c0_73], %67 {strides = array<i32>} : memref<2x16x128xf32, #tpu.memory_space<vmem>>, vector<1x16x128xf32>,
    return
  }
  func.func @transform_0(%arg0: i32) -> (i32, i32, i32) {
    %c0_i32 = arith.constant 0 : i32
    %c0_i32_0 = arith.constant 0 : i32
    %c0_i32_1 = arith.constant 0 : i32
    return %arg0, %c0_i32, %c0_i32_0 : i32, i32, i32
  }
  func.func @transform_1(%arg0: i32) -> (i32, i32, i32) {
    %c0_i32 = arith.constant 0 : i32
    %c0_i32_0 = arith.constant 0 : i32
    %c0_i32_1 = arith.constant 0 : i32
    %c0_i32_2 = arith.constant 0 : i32
    return %c0_i32, %c0_i32_0, %c0_i32_1 : i32, i32, i32
  }
  func.func @transform_2(%arg0: i32) -> (i32, i32) {
    %c0_i32 = arith.constant 0 : i32
    %c0_i32_0 = arith.constant 0 : i32
    %c0_i32_1 = arith.constant 0 : i32
    return %c0_i32, %c0_i32_0 : i32, i32
  }
  func.func @transform_3(%arg0: i32) -> (i32, i32, i32) {
    %c0_i32 = arith.constant 0 : i32
    %c0_i32_0 = arith.constant 0 : i32
    %c0_i32_1 = arith.constant 0 : i32
    %c0_i32_2 = arith.constant 0 : i32
    return %c0_i32, %c0_i32_0, %c0_i32_1 : i32, i32, i32
  }
  func.func @transform_4(%arg0: i32) -> (i32, i32) {
    %c0_i32 = arith.constant 0 : i32
    %c0_i32_0 = arith.constant 0 : i32
    %c0_i32_1 = arith.constant 0 : i32
    return %c0_i32, %c0_i32_0 : i32, i32
  }
  func.func @transform_5(%arg0: i32) -> (i32, i32, i32) {
    %c0_i32 = arith.constant 0 : i32
    %c0_i32_0 = arith.constant 0 : i32
    %c0_i32_1 = arith.constant 0 : i32
    return %arg0, %c0_i32, %c0_i32_0 : i32, i32, i32
  }
}

</mosaic_0001>

<bundles_post_ra>
// kernel: tpu_custom_call.1
= control target key start
LH: loop header
LB: loop body
LE: loop exit
PB: predicated region body
PF: predicated region fallthrough
CT: control target
= control target key end

     0   :  { %10 = vsyncpa [#allocation4], 0  ;;  %s743_s0 = inlined_call_operand.hbm [shape: f32[2,16,64], index: 0, kind: input, shape index: {}]   ;;  %s744_s1 = inlined_call_operand.hbm [shape: f32[3,64,128], index: 1, kind: input, shape index: {}]   ;;  %s745_s2 = inlined_call_operand.vmem [shape: f32[1,128], index: 2, kind: input, shape index: {}]   ;;  %s746_s3 = inlined_call_operand.hbm [shape: f32[3,128,128], index: 3, kind: input, shape index: {}]   ;;  %s747_s4 = inlined_call_operand.vmem [shape: f32[1,128], index: 4, kind: input, shape index: {}]   ;;  %s748_s5 = inlined_call_operand.hbm [shape: f32[2,16,128], index: 5, kind: output, shape index: {}]  }
   0x1   :  { %11 = vsyncpa [#allocation7], 0 }
   0x2   :  { %12 = vsyncpa [#allocation5], 0  ;;  %s30_s20 = sshll.u32 %s744_s1, 4  ;;  %s649_s21 = smov [#allocation6]   ;;  %s31_s20 = int_to_ptr.hbm [resolvable:$true] %s30_s20 }
   0x3   :  { %s32_s22 = sshll.u32 %s649_s21, 4  ;;  %s17_s25 = sshll.u32 %s743_s0, 4  ;;  %s33_s22 = int_to_ptr.vmem [resolvable:$true] %s32_s22  ;;  %s18_s25 = int_to_ptr.hbm [resolvable:$true] %s17_s25 }
   0x4   :  { %s650_s26 = smov 128   ;;  %s651_s27 = smov 8  }
   0x5   :  { %38 = dma.hbm_to_vmem [thread:$0]  %s31_s20, 3072, %s33_s22, [#allocation7], %s650_s26, %s650_s26, %s651_s27  }
   0x6   :  { %s652_s28 = smov [#allocation3]   ;;  %s45_s1 = sshll.u32 %s746_s3, 4  ;;  %s46_s1 = int_to_ptr.hbm [resolvable:$true] %s45_s1 }
   0x7   :  { %s19_s29 = sshll.u32 %s652_s28, 4  ;;  %s653_s0 = smov [#allocation8]   ;;  %s20_s29 = int_to_ptr.vmem [resolvable:$true] %s19_s29 }
   0x8   :  { %25 = dma.hbm_to_vmem [thread:$0]  %s18_s25, 512, %s20_s29, [#allocation4], %s650_s26, %s650_s26, %s651_s27  }
   0x9   :  { %s47_s7 = sshll.u32 %s653_s0, 4  ;;  %s48_s7 = int_to_ptr.vmem [resolvable:$true] %s47_s7 }
   0xa   :  { %53 = dma.hbm_to_vmem [thread:$0]  %s46_s1, 6144, %s48_s7, [#allocation7], %s650_s26, %s650_s26, %s651_s27  }
   0xb   :  { %643 = dma.done.wait [#allocation4], 512  }
   0xc   :  { %644 = vsyncadd [#allocation4], 4294966784 }
   0xd   :  { %645 = dma.done.wait [#allocation7], 9216  }
   0xe   :  { %646 = vsyncadd [#allocation7], 4294958080  ;;  %vm73_vm0 = vcmask 516096   ;;  %v654_v0 = vmov 0.0   ;;  %v109_v1 = vld [vmem:[#allocation6 + $0x78] sm:$0xff]  ;;  %v108_v3 = vld [vmem:[#allocation6 + $0x70] sm:$0xff] }
   0xf   :  { %75 = vst.msk [vmem:[#allocation2 + $0x11] sm:$0x1] %vm73_vm0, %v654_v0  ;;  %v95_v2 = vld [vmem:[#allocation6 + $0x38] sm:$0xff]  ;;  %133 = vmatpush.msra.mxu0 %v109_v1  ;;  %v94_v4 = vld [vmem:[#allocation6 + $0x30] sm:$0xff]  ;;  %v107_v5 = vld [vmem:[#allocation6 + $0x68] sm:$0xff]  ;;  %vm76_vm1 = vcmask 523264  }
  0x10   :  { %79 = vst.msk [vmem:[#allocation2 + $0x12] sm:$0x1] %vm73_vm0, %v654_v0  ;;  %514 = vmatpush.msra.mxu2 %v95_v2  ;;  %v93_v6 = vld [vmem:[#allocation6 + $0x28] sm:$0xff]  ;;  %180 = vmatpush.msra.mxu1 %v95_v2  ;;  %v106_v7 = vld [vmem:[#allocation6 + $0x60] sm:$0xff]  ;;  %v105_v10 = vld [vmem:[#allocation6 + $0x58] sm:$0xff]  ;;  %s485_s13 = sshll.u32 %s748_s5, 4  ;;  %s486_s13 = int_to_ptr.hbm [resolvable:$true] %s485_s13 }
  0x11   :  { %74 = vst.msk [vmem:[#allocation2] sm:$0x1] %vm73_vm0, %v654_v0  ;;  %134 = vmatpush.msra.mxu0 %v108_v3  ;;  %v92_v8 = vld [vmem:[#allocation6 + $0x20] sm:$0xff]  ;;  %v91_v11 = vld [vmem:[#allocation6 + $0x18] sm:$0xff]  ;;  %v69_v13 = vld [vmem:[#allocation3 + $0x8] sm:$0xff] }
  0x12   :  { %80 = vst.msk [vmem:[#allocation2 + $0x23] sm:$0x1] %vm73_vm0, %v654_v0  ;;  %515 = vmatpush.msra.mxu2 %v94_v4  ;;  %181 = vmatpush.msra.mxu1 %v94_v4  ;;  %v68_v9 = vld [vmem:[#allocation3] sm:$0xff]  ;;  %v72_v12 = vld [vmem:[#allocation3 + $0x18] sm:$0xff]  ;;  %v104_v14 = vld [vmem:[#allocation6 + $0x50] sm:$0xff] }
  0x13   :  { %135 = vmatpush.msra.mxu0 %v107_v5  ;;  %77 = vst.msk [vmem:[#allocation2 + $0x1] sm:$0xff] %vm76_vm1, %v68_v9  ;;  %v90_v15 = vld [vmem:[#allocation6 + $0x10] sm:$0xff]  ;;  %v103_v17 = vld [vmem:[#allocation6 + $0x48] sm:$0xff]  ;;  %v102_v19 = vld [vmem:[#allocation6 + $0x40] sm:$0xff] }
  0x14   :  { %516 = vmatpush.msra.mxu2 %v93_v6  ;;  %182 = vmatpush.msra.mxu1 %v93_v6  ;;  %82 = vst.msk [vmem:[#allocation2 + $0x1b] sm:$0xff] %vm76_vm1, %v72_v12  ;;  %v71_v16 = vld [vmem:[#allocation3 + $0x10] sm:$0xff]  ;;  %v89_v18 = vld [vmem:[#allocation6 + $0x8] sm:$0xff]  ;;  %v88_v20 = vld [vmem:[#allocation6] sm:$0xff] }
  0x15   :  { %136 = vmatpush.msra.mxu0 %v106_v7  ;;  %78 = vst.msk [vmem:[#allocation2 + $0x9] sm:$0xff] %vm76_vm1, %v69_v13  ;;  %v217_v22 = vld [vmem:[#allocation6 + $0xb8] sm:$0xff]  ;;  %v216_v24 = vld [vmem:[#allocation6 + $0xb0] sm:$0xff]  ;;  %v215_v26 = vld [vmem:[#allocation6 + $0xa8] sm:$0xff] }
  0x16   :  { %517 = vmatpush.msra.mxu2 %v92_v8  ;;  %183 = vmatpush.msra.mxu1 %v92_v8  ;;  %81 = vst.msk [vmem:[#allocation2 + $0x13] sm:$0xff] %vm76_vm1, %v71_v16  ;;  %v214_v30 = vld [vmem:[#allocation6 + $0xa0] sm:$0xff]  ;;  %v213_v33 = vld [vmem:[#allocation6 + $0x98] sm:$0xff]  ;;  %v212_v34 = vld [vmem:[#allocation6 + $0x90] sm:$0xff] }
  0x17   :  { %137 = vmatpush.msra.mxu0 %v105_v10  ;;  %v211_v37 = vld [vmem:[#allocation6 + $0x88] sm:$0xff]  ;;  %v210_v38 = vld [vmem:[#allocation6 + $0x80] sm:$0xff]  ;;  %v335_v44 = vld [vmem:[#allocation8 + $0xf8] sm:$0xff] }
  0x18   :  { %518 = vmatpush.msra.mxu2 %v91_v11  ;;  %184 = vmatpush.msra.mxu1 %v91_v11  ;;  %v334_v45 = vld [vmem:[#allocation8 + $0xf0] sm:$0xff]  ;;  %v313_v46 = vld [vmem:[#allocation8 + $0x78] sm:$0xff]  ;;  %v333_v48 = vld [vmem:[#allocation8 + $0xe8] sm:$0xff] }
  0x19   :  { %138 = vmatpush.msra.mxu0 %v104_v14  ;;  %336 = vmatpush.msra.mxu3 %v335_v44  ;;  %v312_v47 = vld [vmem:[#allocation8 + $0x70] sm:$0xff]  ;;  %v332_v49 = vld [vmem:[#allocation8 + $0xe0] sm:$0xff]  ;;  %v331_v50 = vld [vmem:[#allocation8 + $0xd8] sm:$0xff] }
  0x1a   :  { %519 = vmatpush.msra.mxu2 %v90_v15  ;;  %185 = vmatpush.msra.mxu1 %v90_v15  ;;  %v96_v21 = vld [vmem:[#allocation2 + $0x1] sm:$0xff]  ;;  %v330_v51 = vld [vmem:[#allocation8 + $0xd0] sm:$0xff]  ;;  %v311_v52 = vld [vmem:[#allocation8 + $0x68] sm:$0xff] }
  0x1b   :  { %139 = vmatpush.msra.mxu0 %v103_v17  ;;  %v83_v23 = vld [vmem:[#allocation2] sm:$0xff]  ;;  %337 = vmatpush.msra.mxu3 %v334_v45  ;;  %v310_v53 = vld [vmem:[#allocation8 + $0x60] sm:$0xff]  ;;  %v420_v55 = vld [vmem:[#allocation8 + $0x170] sm:$0xff] }
  0x1c   :  { %520 = vmatpush.msra.mxu2 %v89_v18  ;;  %186 = vmatpush.msra.mxu1 %v89_v18  ;;  %284 = vst [vmem:[#allocation2] sm:$0x1] %v654_v0  ;;  %v87_v25 = vld [vmem:[#allocation2 + $0x20] sm:$0x3]  ;;  %v205_v28 = vld [vmem:[#allocation2 + $0xa] sm:$0xff]  ;;  %v204_v39 = vld [vmem:[#allocation2 + $0x2] sm:$0xff] }
  0x1d   :  { %140 = vmatpush.msra.mxu0 %v102_v19  ;;  %v98_v27 = vld [vmem:[#allocation2 + $0x11] sm:$0xff]  ;;  %v97_v32 = vld [vmem:[#allocation2 + $0x9] sm:$0xff]  ;;  %v208_v36 = vld [vmem:[#allocation2 + $0x22] sm:$0x3]  ;;  %338 = vmatpush.msra.mxu3 %v333_v48 }
  0x1e   :  { %521 = vmatpush.msra.mxu2 %v88_v20  ;;  %499 = vmatmul.msk.f32.vlgmr.msra.gmra.mxu0 %vm76_vm1, %v96_v21  ;;  %v85_v29 = vld [vmem:[#allocation2 + $0x10] sm:$0xff]  ;;  %v84_v35 = vld [vmem:[#allocation2 + $0x8] sm:$0xff]  ;;  %289 = vst [vmem:[#allocation2 + $0x23] sm:$0x1] %v654_v0  ;;  %v99_v40 = vld [vmem:[#allocation2 + $0x19] sm:$0xff] }
  0x1f   :  { %508 = vmatmul.msk.f32.vlgmr.msra.gmra.mxu2 %vm76_vm1, %v87_v25  ;;  %187 = vmatpush.msra.mxu1 %v88_v20  ;;  %v206_v31 = vld [vmem:[#allocation2 + $0x12] sm:$0xff]  ;;  %285 = vst [vmem:[#allocation2 + $0x11] sm:$0x1] %v654_v0  ;;  %v100_v42 = vld [vmem:[#allocation2 + $0x21] sm:$0x3]  ;;  %v328_v58 = vld [vmem:[#allocation8 + $0xc0] sm:$0xff] }
  0x20   :  { %241 = vmatpush.msrb.mxu2 %v217_v22  ;;  %504 = vmatmul.msk.f32.vlgmr.msra.gmra.mxu1 %vm76_vm1, %v83_v23  ;;  %288 = vst [vmem:[#allocation2 + $0x12] sm:$0x1] %v654_v0  ;;  %v86_v41 = vld [vmem:[#allocation2 + $0x18] sm:$0xff]  ;;  %v421_v54 = vld [vmem:[#allocation8 + $0x178] sm:$0xff]  ;;  %v329_v57 = vld [vmem:[#allocation8 + $0xc8] sm:$0xff] }
  0x21   :  { %v207_v43 = vld [vmem:[#allocation2 + $0x1a] sm:$0xff]  ;;  %368 = vmatpush.msrb.mxu0 %v313_v46  ;;  %339 = vmatpush.msra.mxu3 %v332_v49  ;;  %v419_v62 = vld [vmem:[#allocation8 + $0x168] sm:$0xff]  ;;  %v418_v0 = vld [vmem:[#allocation8 + $0x160] sm:$0xff] }
  0x22   :  { %242 = vmatpush.msrb.mxu2 %v216_v24  ;;  %422 = vmatpush.msrb.mxu1 %v421_v54  ;;  %v309_v56 = vld [vmem:[#allocation8 + $0x58] sm:$0xff]  ;;  %v308_v59 = vld [vmem:[#allocation8 + $0x50] sm:$0xff]  ;;  %v307_v63 = vld [vmem:[#allocation8 + $0x48] sm:$0xff] }
  0x23   :  { %369 = vmatpush.msrb.mxu0 %v312_v47  ;;  %340 = vmatpush.msra.mxu3 %v331_v50  ;;  %v327_v60 = vld [vmem:[#allocation8 + $0xb8] sm:$0xff]  ;;  %v326_v61 = vld [vmem:[#allocation8 + $0xb0] sm:$0xff]  ;;  %v306_v1 = vld [vmem:[#allocation8 + $0x40] sm:$0xff] }
  0x24   :  { %243 = vmatpush.msrb.mxu2 %v215_v26  ;;  %423 = vmatpush.msrb.mxu1 %v420_v55  ;;  %v325_v2 = vld [vmem:[#allocation8 + $0xa8] sm:$0xff]  ;;  %v417_v3 = vld [vmem:[#allocation8 + $0x158] sm:$0xff]  ;;  %v324_v4 = vld [vmem:[#allocation8 + $0xa0] sm:$0xff] }
  0x25   :  { %341 = vmatpush.msra.mxu3 %v330_v51  ;;  %370 = vmatpush.msrb.mxu0 %v311_v52  ;;  %v305_v5 = vld [vmem:[#allocation8 + $0x38] sm:$0xff]  ;;  %v416_v7 = vld [vmem:[#allocation8 + $0x150] sm:$0xff]  ;;  %v415_v10 = vld [vmem:[#allocation8 + $0x148] sm:$0xff] }
  0x26   :  { %244 = vmatpush.msrb.mxu2 %v214_v30  ;;  %500 = vmatmul.msk.f32.gmra.mxu0 %vm76_vm1, %v97_v32  ;;  %v323_v6 = vld [vmem:[#allocation8 + $0x98] sm:$0xff]  ;;  %v304_v8 = vld [vmem:[#allocation8 + $0x30] sm:$0xff]  ;;  %v303_v11 = vld [vmem:[#allocation8 + $0x28] sm:$0xff] }
  0x27   :  { %371 = vmatpush.msrb.mxu0 %v310_v53  ;;  %342 = vmatpush.msra.mxu3 %v329_v57  ;;  %v322_v9 = vld [vmem:[#allocation8 + $0x90] sm:$0xff]  ;;  %v321_v12 = vld [vmem:[#allocation8 + $0x88] sm:$0xff]  ;;  %v414_v13 = vld [vmem:[#allocation8 + $0x140] sm:$0xff] }
  0x28   :  { %245 = vmatpush.msrb.mxu2 %v213_v33  ;;  %505 = vmatmul.msk.f32.gmra.mxu1 %vm76_vm1, %v84_v35  ;;  %v302_v14 = vld [vmem:[#allocation8 + $0x20] sm:$0xff]  ;;  %v413_v16 = vld [vmem:[#allocation8 + $0x138] sm:$0xff]  ;;  %v412_v18 = vld [vmem:[#allocation8 + $0x130] sm:$0xff] }
  0x29   :  { %372 = vmatpush.msrb.mxu0 %v309_v56  ;;  %343 = vmatpush.msra.mxu3 %v328_v58  ;;  %v320_v15 = vld [vmem:[#allocation8 + $0x80] sm:$0xff]  ;;  %v301_v17 = vld [vmem:[#allocation8 + $0x18] sm:$0xff]  ;;  %v300_v19 = vld [vmem:[#allocation8 + $0x10] sm:$0xff] }
  0x2a   :  { %246 = vmatpush.msrb.mxu2 %v212_v34  ;;  %424 = vmatpush.msrb.mxu1 %v419_v62  ;;  %v411_v20 = vld [vmem:[#allocation8 + $0x128] sm:$0xff]  ;;  %v410_v22 = vld [vmem:[#allocation8 + $0x120] sm:$0xff]  ;;  %v409_v24 = vld [vmem:[#allocation8 + $0x118] sm:$0xff] }
  0x2b   :  { %373 = vmatpush.msrb.mxu0 %v308_v59  ;;  %344 = vmatpush.msra.mxu3 %v327_v60  ;;  %v299_v21 = vld [vmem:[#allocation8 + $0x8] sm:$0xff]  ;;  %v298_v23 = vld [vmem:[#allocation8] sm:$0xff]  ;;  %v408_v25 = vld [vmem:[#allocation8 + $0x110] sm:$0xff] }
  0x2c   :  { %247 = vmatpush.msrb.mxu2 %v211_v37  ;;  %425 = vmatpush.msrb.mxu1 %v418_v0  ;;  %v545_v34 = vld [vmem:[%s745_s2] ss:$0 sm:$0xff] }
  0x2d   :  { %374 = vmatpush.msrb.mxu0 %v307_v63  ;;  %345 = vmatpush.msra.mxu3 %v326_v61 }
  0x2e   :  { %248 = vmatpush.msrb.mxu2 %v210_v38  ;;  %501 = vmatmul.msk.f32.gmra.mxu0 %vm76_vm1, %v98_v27  ;;  %v407_v27 = vld [vmem:[#allocation8 + $0x108] sm:$0xff] }
  0x2f   :  { %509 = vmatmul.msk.f32.vlgmr.msrb.gmra.mxu2 %vm76_vm1, %v204_v39  ;;  %375 = vmatpush.msrb.mxu0 %v306_v1 }
  0x30   :  { %506 = vmatmul.msk.f32.gmra.mxu1 %vm76_vm1, %v85_v29  ;;  %522 = vmatpush.msra.mxu2 %v313_v46  ;;  %v406_v29 = vld [vmem:[#allocation8 + $0x100] sm:$0xff] }
  0x31   :  { %346 = vmatpush.msra.mxu3 %v325_v2  ;;  %426 = vmatpush.msrb.mxu1 %v417_v3 }
  0x32   :  { %523 = vmatpush.msra.mxu2 %v312_v47  ;;  %376 = vmatpush.msrb.mxu0 %v305_v5 }
  0x33   :  { %347 = vmatpush.msra.mxu3 %v324_v4  ;;  %427 = vmatpush.msrb.mxu1 %v416_v7 }
  0x34   :  { %524 = vmatpush.msra.mxu2 %v311_v52  ;;  %377 = vmatpush.msrb.mxu0 %v304_v8 }
  0x35   :  { %348 = vmatpush.msra.mxu3 %v323_v6  ;;  %428 = vmatpush.msrb.mxu1 %v415_v10 }
  0x36   :  { %502 = vmatmul.msk.f32.gmra.mxu0 %vm76_vm1, %v99_v40  ;;  %525 = vmatpush.msra.mxu2 %v310_v53 }
  0x37   :  { %510 = vmatmul.msk.f32.gmra.mxu2 %vm76_vm1, %v205_v28  ;;  %378 = vmatpush.msrb.mxu0 %v303_v11 }
  0x38   :  { %507 = vmatmul.msk.f32.gmra.mxu1 %vm76_vm1, %v86_v41  ;;  %526 = vmatpush.msra.mxu2 %v309_v56 }
  0x39   :  { %349 = vmatpush.msra.mxu3 %v322_v9  ;;  %429 = vmatpush.msrb.mxu1 %v414_v13 }
  0x3a   :  { %527 = vmatpush.msra.mxu2 %v308_v59  ;;  %379 = vmatpush.msrb.mxu0 %v302_v14 }
  0x3b   :  { %350 = vmatpush.msra.mxu3 %v321_v12  ;;  %430 = vmatpush.msrb.mxu1 %v413_v16 }
  0x3c   :  { %528 = vmatpush.msra.mxu2 %v307_v63  ;;  %380 = vmatpush.msrb.mxu0 %v301_v17 }
  0x3d   :  { %351 = vmatpush.msra.mxu3 %v320_v15  ;;  %431 = vmatpush.msrb.mxu1 %v412_v18  ;;  %v546_v15 = vld [vmem:[%s747_s4] ss:$0 sm:$0xff]  ;;  %s655_s4 = smov [#allocation9]  }
  0x3e   :  { %503 = vmatmul.msk.f32.gmra.mxu0 %vm76_vm1, %v100_v42  ;;  %529 = vmatpush.msra.mxu2 %v306_v1  ;;  %s483_s10 = sshll.u32 %s655_s4, 4  ;;  %s484_s10 = int_to_ptr.vmem [resolvable:$true] %s483_s10 }
  0x3f   :  { %511 = vmatmul.msk.f32.gmra.mxu2 %vm76_vm1, %v206_v31  ;;  %381 = vmatpush.msrb.mxu0 %v300_v19 }
  0x40   :  { %530 = vmatpush.msra.mxu2 %v305_v5  ;;  %432 = vmatpush.msrb.mxu1 %v411_v20 }
  0x41   :  { %382 = vmatpush.msrb.mxu0 %v299_v21 }
  0x42   :  { %531 = vmatpush.msra.mxu2 %v304_v8  ;;  %433 = vmatpush.msrb.mxu1 %v410_v22 }
  0x43   :  { %383 = vmatpush.msrb.mxu0 %v298_v23 }
  0x44   :  { %532 = vmatpush.msra.mxu2 %v303_v11  ;;  %434 = vmatpush.msrb.mxu1 %v409_v24 }
  0x46   :  { %533 = vmatpush.msra.mxu2 %v302_v14  ;;  %435 = vmatpush.msrb.mxu1 %v408_v25 }
  0x47   :  { %512 = vmatmul.msk.f32.gmra.mxu2 %vm76_vm1, %v207_v43 }
  0x48   :  { %534 = vmatpush.msra.mxu2 %v301_v17  ;;  %436 = vmatpush.msrb.mxu1 %v407_v27 }
  0x4a   :  { %535 = vmatpush.msra.mxu2 %v300_v19  ;;  %437 = vmatpush.msrb.mxu1 %v406_v29 }
  0x4c   :  { %536 = vmatpush.msra.mxu2 %v299_v21 }
  0x4e   :  { %537 = vmatpush.msra.mxu2 %v298_v23 }
  0x4f   :  { %513 = vmatmul.msk.f32.gmra.mxu2 %vm76_vm1, %v208_v36 }
  0x9b   :  { %v142_v26 = vpop.f32.mrf.mxu0 }
  0x9d   :  { %v189_v28 = vpop.f32.mrf.mxu1 }
  0x9e   :  { %v190_v32 = vadd.f32 %v189_v28, %v142_v26 }
  0xa2   :  { %v201_v30 = vpop.f32.mrf.mxu2 }
  0xa3   :  { %v145_v31 = vpop.f32.mrf.mxu0 }
  0xa5   :  { %v192_v33 = vpop.f32.mrf.mxu1 }
  0xa6   :  { %v193_v39 = vadd.f32 %v192_v33, %v145_v31 }
  0xab   :  { %v148_v40 = vpop.f32.mrf.mxu0 }
  0xad   :  { %v195_v42 = vpop.f32.mrf.mxu1 }
  0xae   :  { %v196_v46 = vadd.f32 %v195_v42, %v148_v40 }
  0xb2   :  { %v250_v35 = vpop.f32.mrf.mxu2 }
  0xb3   :  { %v265_v36 = vadd.f32 %v250_v35, %v190_v32  ;;  %v151_v50 = vpop.f32.mrf.mxu0 }
  0xb5   :  { %v274_v37 = vadd.f32 %v545_v34, %v265_v36  ;;  %v198_v51 = vpop.f32.mrf.mxu1 }
  0xb6   :  { %v199_v54 = vadd.f32 %v198_v51, %v151_v50 }
  0xb7   :  { %v279_v38 = vmax.f32 %v274_v37, 0.0 }
  0xb9   :  { %286 = vst [vmem:[#allocation2 + $0x1] sm:$0xff] %v279_v38  ;;  %352 = vmatmul.f32.vlgmr.msra.gmra.mxu3 %v279_v38 }
  0xba   :  { %v253_v41 = vpop.f32.mrf.mxu2 }
  0xbb   :  { %v266_v43 = vadd.f32 %v253_v41, %v193_v39  ;;  %v154_v60 = vpop.f32.mrf.mxu0 }
  0xbc   :  { %v202_v0 = vadd.f32 %v201_v30, %v154_v60 }
  0xbd   :  { %v275_v44 = vadd.f32 %v545_v34, %v266_v43 }
  0xbf   :  { %v280_v45 = vmax.f32 %v275_v44, 0.0 }
  0xc0   :  { %v293_v47 = vld [vmem:[#allocation2] sm:$0xff] }
  0xc1   :  { %287 = vst [vmem:[#allocation2 + $0x9] sm:$0xff] %v280_v45  ;;  %384 = vmatmul.f32.vlgmr.msrb.gmra.mxu0 %v293_v47  ;;  %355 = vmatmul.f32.gmra.mxu3 %v280_v45 }
  0xc2   :  { %v256_v48 = vpop.f32.mrf.mxu2 }
  0xc3   :  { %v267_v49 = vadd.f32 %v256_v48, %v196_v46 }
  0xc5   :  { %v276_v52 = vadd.f32 %v545_v34, %v267_v49 }
  0xc7   :  { %v281_v53 = vmax.f32 %v276_v52, 0.0 }
  0xc8   :  { %v294_v55 = vld [vmem:[#allocation2 + $0x8] sm:$0xff] }
  0xc9   :  { %v400_v56 = vld [vmem:[#allocation2 + $0x2] sm:$0xff]  ;;  %290 = vst [vmem:[#allocation2 + $0x11] sm:$0xfc] %v281_v53  ;;  %387 = vmatmul.f32.gmra.mxu0 %v294_v55  ;;  %v401_v1 = vld [vmem:[#allocation2 + $0xa] sm:$0xff] }
  0xca   :  { %438 = vmatmul.f32.vlgmr.msrb.gmra.mxu1 %v400_v56  ;;  %v259_v57 = vpop.f32.mrf.mxu2 }
  0xcb   :  { %v268_v58 = vadd.f32 %v259_v57, %v199_v54 }
  0xcd   :  { %v277_v59 = vadd.f32 %v545_v34, %v268_v58 }
  0xcf   :  { %v282_v61 = vmax.f32 %v277_v59, 0.0 }
  0xd0   :  { %v316_v62 = vld [vmem:[#allocation2 + $0x11] sm:$0xff] }
  0xd1   :  { %v295_v63 = vld [vmem:[#allocation2 + $0x10] sm:$0xff]  ;;  %291 = vst [vmem:[#allocation2 + $0x19] sm:$0xff] %v282_v61  ;;  %358 = vmatmul.f32.gmra.mxu3 %v316_v62 }
  0xd2   :  { %390 = vmatmul.f32.gmra.mxu0 %v295_v63  ;;  %441 = vmatmul.f32.gmra.mxu1 %v401_v1  ;;  %v262_v2 = vpop.f32.mrf.mxu2 }
  0xd3   :  { %v269_v3 = vadd.f32 %v262_v2, %v202_v0 }
  0xd5   :  { %v278_v4 = vadd.f32 %v545_v34, %v269_v3 }
  0xd7   :  { %v283_v5 = vmax.f32 %v278_v4, 0.0 }
  0xd8   :  { %v296_v6 = vld [vmem:[#allocation2 + $0x18] sm:$0xff] }
  0xd9   :  { %v402_v7 = vld [vmem:[#allocation2 + $0x12] sm:$0xff]  ;;  %292 = vst [vmem:[#allocation2 + $0x21] sm:$0x3] %v283_v5  ;;  %361 = vmatmul.f32.gmra.mxu3 %v282_v61  ;;  %393 = vmatmul.f32.vlgmr.msra.gmra.mxu2 %v296_v6 }
  0xda   :  { %444 = vmatmul.f32.gmra.mxu1 %v402_v7 }
  0xe0   :  { %v318_v8 = vld [vmem:[#allocation2 + $0x21] sm:$0x3] }
  0xe1   :  { %v297_v9 = vld [vmem:[#allocation2 + $0x20] sm:$0x3]  ;;  %364 = vmatmul.f32.gmra.mxu3 %v318_v8  ;;  %v404_v11 = vld [vmem:[#allocation2 + $0x22] sm:$0x3] }
  0xe2   :  { %v403_v10 = vld [vmem:[#allocation2 + $0x1a] sm:$0xff]  ;;  %396 = vmatmul.f32.gmra.mxu2 %v297_v9 }
  0xe3   :  { %447 = vmatmul.f32.gmra.mxu1 %v403_v10 }
  0xeb   :  { %450 = vmatmul.f32.gmra.mxu1 %v404_v11 }
 0x13c   :  { %v353_v13 = vpop.f32.mrf.mxu3 }
 0x13e   :  { %v385_v12 = vpop.f32.mrf.mxu0 }
 0x13f   :  { %v386_v14 = vadd.f32 %v385_v12, %v353_v13 }
 0x144   :  { %v356_v21 = vpop.f32.mrf.mxu3 }
 0x146   :  { %v388_v19 = vpop.f32.mrf.mxu0 }
 0x147   :  { %v439_v16 = vpop.f32.mrf.mxu1  ;;  %v389_v22 = vadd.f32 %v388_v19, %v356_v21 }
 0x148   :  { %v454_v17 = vadd.f32 %v439_v16, %v386_v14 }
 0x14a   :  { %v463_v18 = vadd.f32 %v546_v15, %v454_v17 }
 0x14c   :  { %v468_v20 = vmax.f32 %v463_v18, 0.0 }
 0x14e   :  { %473 = vst [vmem:[#allocation9] sm:$0xff] %v468_v20 }
 0x14f   :  { %v442_v23 = vpop.f32.mrf.mxu1  ;;  %v391_v26 = vpop.f32.mrf.mxu0 }
 0x150   :  { %v455_v24 = vadd.f32 %v442_v23, %v389_v22 }
 0x152   :  { %v464_v25 = vadd.f32 %v546_v15, %v455_v24 }
 0x154   :  { %v469_v27 = vmax.f32 %v464_v25, 0.0  ;;  %v359_v28 = vpop.f32.mrf.mxu3 }
 0x155   :  { %v392_v29 = vadd.f32 %v391_v26, %v359_v28 }
 0x156   :  { %474 = vst [vmem:[#allocation9 + $0x8] sm:$0xff] %v469_v27 }
 0x157   :  { %v445_v30 = vpop.f32.mrf.mxu1 }
 0x158   :  { %v456_v31 = vadd.f32 %v445_v30, %v392_v29 }
 0x15a   :  { %v465_v32 = vadd.f32 %v546_v15, %v456_v31 }
 0x15c   :  { %v470_v33 = vmax.f32 %v465_v32, 0.0  ;;  %v362_v34 = vpop.f32.mrf.mxu3  ;;  %v394_v35 = vpop.f32.mrf.mxu2 }
 0x15d   :  { %v395_v36 = vadd.f32 %v394_v35, %v362_v34 }
 0x15e   :  { %476 = vst [vmem:[#allocation9 + $0xe] sm:$0xfc] %v470_v33 }
 0x160   :  { %v448_v37 = vpop.f32.mrf.mxu1 }
 0x161   :  { %v457_v38 = vadd.f32 %v448_v37, %v395_v36 }
 0x163   :  { %v466_v39 = vadd.f32 %v546_v15, %v457_v38 }
 0x164   :  { %v365_v41 = vpop.f32.mrf.mxu3 }
 0x165   :  { %v471_v40 = vmax.f32 %v466_v39, 0.0  ;;  %v397_v42 = vpop.f32.mrf.mxu2 }
 0x166   :  { %v398_v43 = vadd.f32 %v397_v42, %v365_v41 }
 0x167   :  { %477 = vst [vmem:[#allocation9 + $0x16] sm:$0xff] %v471_v40 }
 0x168   :  { %v451_v44 = vpop.f32.mrf.mxu1 }
 0x169   :  { %v458_v45 = vadd.f32 %v451_v44, %v398_v43 }
 0x16b   :  { %v467_v46 = vadd.f32 %v546_v15, %v458_v45 }
 0x16d   :  { %v472_v47 = vmax.f32 %v467_v46, 0.0 }
 0x16f   :  { %478 = vst [vmem:[#allocation9 + $0x1e] sm:$0x3] %v472_v47 }
 0x170   :  { %491 = dma.vmem_to_hbm [thread:$0]  %s484_s10, 512, %s486_s13, [#allocation5], %s650_s26, %s650_s26, %s651_s27  }
 0x171   :  { %647 = dma.done.wait [#allocation5], 512  }
 0x172   :  { %648 = vsyncadd [#allocation5], 4294966784 }
 0x173   :  { %496 = vsyncpa [#allocation4], 1 }
 0x174   :  { %497 = vsyncpa [#allocation7], 1 }
 0x175   :  { %498 = vsyncpa [#allocation5], 1 }

</bundles_post_ra>
